<compile_context>
chip_gen: v6e
topology: v6e:2x2x1
jax: 0.10.0
libtpu: 0.0.40
codegen_flags: <defaults>
</compile_context>

<pallas_src>
import math
import numpy as np
import jax
import jax.numpy as jnp
from jax.experimental import pallas as pl
from jax.experimental.pallas import tpu as pltpu

EPS = 1e-07

# ----------------------------- module configuration -------------------------
DEPTH = 3          # order of the polynomial (depth)
BASEALPHA = 1.0    # alpha
JACOBI_A = 1.0
JACOBI_B = 1.0
AGGR = "gcn"
NORMALIZED_BASES = False   # module default


# ----------------------- parameter / coefficient setup ----------------------
def make_alphas(depth, basealpha):
    # nn.Parameter(torch.tensor(min(1/alpha, 1))) for each i, then
    # alphas[i] = basealpha * tanh(param_i)
    param = float(min(1.0 / basealpha, 1.0))
    return np.array([basealpha * np.tanh(param)] * (depth + 1), dtype=np.float64)


def jacobi_coefs(depth, alphas, a, b, l=-1.0, r=1.0):
    """Fold the Jacobi recursion into per-order scalar coefficients.

    For L >= 1:  x_L = c0 * (adj @ x_{L-1}) + c1 * x_{L-1} + c2 * x_{L-2}
    Row 0 is unused; row 1 has c2 == 0 exactly.
    """
    coefs = np.zeros((depth + 1, 3), dtype=np.float32)
    if depth >= 1:
        coef1 = (a - b) / 2 - (a + b + 2) / 2 * (l + r) / (r - l)
        coef1 *= alphas[0]
        coef2 = (a + b + 2) / (r - l)
        coef2 *= alphas[0]
        coefs[1] = [coef2, coef1, 0.0]
    for L in range(2, depth + 1):
        coef_l = 2 * L * (L + a + b) * (2 * L - 2 + a + b)
        coef_lm1_1 = (2 * L + a + b - 1) * (2 * L + a + b) * (2 * L + a + b - 2)
        coef_lm1_2 = (2 * L + a + b - 1) * (a ** 2 - b ** 2)
        coef_lm2 = 2 * (L - 1 + a) * (L - 1 + b) * (2 * L + a + b)
        tmp1 = alphas[L - 1] * (coef_lm1_1 / coef_l)
        tmp2 = alphas[L - 1] * (coef_lm1_2 / coef_l)
        tmp3 = alphas[L - 1] * alphas[L - 2] * (coef_lm2 / coef_l)
        tmp1_2 = tmp1 * (2 / (r - l))
        tmp2_2 = tmp1 * ((r + l) / (r - l)) + tmp2
        coefs[L] = [tmp1_2, -tmp2_2, -tmp3]
    return coefs


def jacobi_norms(a, b, K):
    """get_norm_weight_formula_np equivalent (pure host math, lgamma based)."""
    out = []
    for i in range(K + 1):
        t1 = 2.0 ** (a + b + 1) / (2 * i + a + b + 1)
        t2 = math.exp(math.lgamma(i + a + 1) - math.lgamma(i + a + b + 1))
        t3 = math.exp(math.lgamma(i + b + 1) - math.lgamma(i + 1))
        out.append(math.sqrt(t1 * t2 * t3))
    return np.asarray(out, dtype=np.float32)


def build_adj_dense(edge_index, edge_weight, n_node, aggr="gcn"):
    """Dense equivalent of buildAdj.

    Semantics note (matches the PyTorch reference exactly):
      * torch_geometric.utils.degree(edge_index[0]) counts EDGES per source node
        (it ignores edge_weight), so deg here is an occurrence count as well.
      * SparseTensor(...).coalesce() sums values of duplicate (row, col) pairs;
        the scatter-add below does the same.
    """
    row, col = edge_index[0], edge_index[1]
    deg = jnp.zeros((n_node,), jnp.float32).at[row].add(1.0)
    deg = jnp.where(deg < 0.5, deg + 1.0, deg)
    if aggr == "mean":
        val = (1.0 / deg)[row] * edge_weight
    elif aggr == "sum":
        val = edge_weight
    elif aggr == "gcn":
        dinv = deg ** -0.5
        val = dinv[row] * edge_weight * dinv[col]
    else:
        raise NotImplementedError(aggr)
    adj = jnp.zeros((n_node, n_node), jnp.float32).at[row, col].add(val)
    return adj


# ------------------------------- Pallas kernel -------------------------------
def make_jacobi_kernel(depth, coefs):
    # Bake coefficients as python floats -> folded into VPU immediates.
    coefs = [tuple(float(c) for c in row) for row in np.asarray(coefs, np.float32)]

    def kernel(adj_ref, x_ref, out_ref):
        # adj_ref: (N, N) bf16   -- constant block index: DMA'd once, resident
        # x_ref  : (1, N, TF) f32 feature slab for this grid step
        # out_ref: (N, (depth+1)*TF) f32 -- single lane-dense store
        adj = adj_ref[...]                      # keep bf16 for the MXU
        x0 = x_ref[0]                           # (N, TF) f32
        parts = [x0]
        xm2 = x0
        xm1 = x0
        if depth >= 1:
            c0, c1, _ = coefs[1]                # x_{L-2} coefficient is exactly 0
            ax = jnp.dot(adj, x0.astype(jnp.bfloat16),
                         preferred_element_type=jnp.float32)
            xm1 = c0 * ax + c1 * x0
            parts.append(xm1)
        for L in range(2, depth + 1):           # static unroll: depth is small/fixed
            c0, c1, c2 = coefs[L]
            ax = jnp.dot(adj, xm1.astype(jnp.bfloat16),
                         preferred_element_type=jnp.float32)
            nx = c0 * ax + c1 * xm1 + c2 * xm2
            parts.append(nx)
            xm2, xm1 = xm1, nx
        # One concatenated store; (depth+1)*TF is a multiple of 128 -> full vst.
        out_ref[...] = jnp.concatenate(parts, axis=-1).astype(out_ref.dtype)

    return kernel


def _choose_feat_tile(feat, depth):
    """Largest divisor of feat whose concatenated width (depth+1)*tf is 128-lane dense."""
    for tf_ in range(feat, 0, -1):
        if feat % tf_ == 0 and ((depth + 1) * tf_) % 128 == 0:
            return tf_
    return feat   # fallback: still correct, stores may be masked


def poly_conv_frame(x, edge_index, edge_weight, *, feat_tile=None):
    """Forward of PolyConvFrame(JacobiConv) -> (N, depth+1, F)."""
    n_node, feat = x.shape
    depth = DEPTH

    # adj in bf16: halves HBM->VMEM DMA for the dominant buffer; MXU takes bf16
    # natively on v5e/v6e/v7x, accumulation stays f32.
    adj = build_adj_dense(edge_index, edge_weight, n_node, AGGR).astype(jnp.bfloat16)

    alphas = make_alphas(depth, BASEALPHA)
    coefs = jacobi_coefs(depth, alphas, JACOBI_A, JACOBI_B)   # static numpy -> baked

    tf_ = feat_tile if feat_tile is not None else _choose_feat_tile(feat, depth)
    assert feat % tf_ == 0, (feat, tf_)
    num_fblk = feat // tf_

    # Feature slabs are independent across the WHOLE recursion, so they form a
    # clean "parallel" grid axis (megacore on v7x).  Pre-slice x as
    # (num_fblk, N, TF) so every BlockSpec block equals its full trailing dims.
    x_slabs = x.reshape(n_node, num_fblk, tf_).transpose(1, 0, 2)

    out_w = (depth + 1) * tf_
    kernel = make_jacobi_kernel(depth, coefs)

    cost = pl.CostEstimate(
        flops=2 * n_node * n_node * feat * depth + 5 * n_node * feat * depth,
        transcendentals=0,
        bytes_accessed=2 * n_node * n_node            # adj (bf16), fetched once
        + 4 * n_node * feat                           # x (f32)
        + 4 * n_node * (depth + 1) * feat,            # output (f32)
    )

    # TODO(synk): for graphs where the (N,N) adj no longer fits VMEM (esp. v7x's
    # 64 MiB), stream adj row tiles (memory_space=pl.ANY + manual DMA, or a
    # row-block grid axis with pipeline_mode=pl.Buffered(3)) while keeping
    # x_{L-1}/x_{L-2} in full-(N,F) VMEM scratch; resident adj is optimal here.
    out = pl.pallas_call(
        kernel,
        out_shape=jax.ShapeDtypeStruct((n_node, num_fblk * out_w), jnp.float32),
        grid=(num_fblk,),
        in_specs=[
            pl.BlockSpec((n_node, n_node), lambda j: (0, 0)),     # adj: resident
            pl.BlockSpec((1, n_node, tf_), lambda j: (j, 0, 0)),  # x slab j
        ],
        out_specs=pl.BlockSpec((n_node, out_w), lambda j: (0, j)),
        compiler_params=pltpu.CompilerParams(dimension_semantics=("parallel",)),
        cost_estimate=cost,
    )(adj, x_slabs)

    # Per-slab lane layout is [x_0 | x_1 | ... | x_depth].
    out = out.reshape(n_node, num_fblk, depth + 1, tf_)
    if num_fblk == 1:
        out = out.reshape(n_node, depth + 1, feat)     # free reshape, no transpose
    else:
        out = out.transpose(0, 2, 1, 3).reshape(n_node, depth + 1, feat)

    if NORMALIZED_BASES:
        norms = jnp.asarray(jacobi_norms(JACOBI_A, JACOBI_B, depth)).reshape(1, depth + 1, 1)
        out = out / (norms + EPS)
    return out


# ------------------------------ pure-JAX references -------------------------
def _poly_conv_frame_ref(x, edge_index, edge_weight, *, bf16_dot):
    adj = build_adj_dense(edge_index, edge_weight, x.shape[0], AGGR)
    if bf16_dot:
        adj = adj.astype(jnp.bfloat16)
    alphas = make_alphas(DEPTH, BASEALPHA)
    coefs = jacobi_coefs(DEPTH, alphas, JACOBI_A, JACOBI_B)
    xs = [x.astype(jnp.float32)]
    for L in range(1, DEPTH + 1):
        xm1 = xs[-1]
        xm2 = xs[-2] if L >= 2 else xs[-1]
        lhs = xm1.astype(jnp.bfloat16) if bf16_dot else xm1
        ax = jnp.dot(adj, lhs, preferred_element_type=jnp.float32)
        nx = coefs[L, 0] * ax + coefs[L, 1] * xm1 + coefs[L, 2] * xm2
        xs.append(nx)
    out = jnp.stack(xs, axis=1)
    if NORMALIZED_BASES:
        norms = jnp.asarray(jacobi_norms(JACOBI_A, JACOBI_B, DEPTH)).reshape(1, DEPTH + 1, 1)
        out = out / (norms + EPS)
    return out


# ----------------------------------- main ------------------------------------
if __name__ == "__main__":
    key = jax.random.PRNGKey(0)

    # (n_node, feat, n_edge, feat_tile):
    #   config 1: F = 32 -> single 128-lane slab, no wrapper transpose at all.
    #   config 2: F = 64 with feat_tile=32 -> 2 independent slabs exercising the
    #             "parallel" grid axis (2 TensorCores on v7x).
    configs = [
        (128, 32, 512, None),
        (128, 64, 1024, 32),
    ]
    for (n_node, feat, n_edge, ftile) in configs:
        key, kx, ke, kw = jax.random.split(key, 4)
        x = jax.random.normal(kx, (n_node, feat), dtype=jnp.float32)
        edge_index = jax.random.randint(ke, (2, n_edge), 0, n_node, dtype=jnp.int32)
        edge_weight = jax.random.uniform(kw, (n_edge,), jnp.float32, 0.5, 1.5)

        out = jax.block_until_ready(
            poly_conv_frame(x, edge_index, edge_weight, feat_tile=ftile))
        assert out.shape == (n_node, DEPTH + 1, feat), out.shape

        # Tight check vs. a reference that mirrors the kernel's bf16-MXU math.
        ref_b = jax.block_until_ready(
            _poly_conv_frame_ref(x, edge_index, edge_weight, bf16_dot=True))
        assert np.allclose(np.asarray(out), np.asarray(ref_b), rtol=1e-4, atol=1e-4), \
            "mismatch vs bf16-matched reference"

        # Loose sanity check vs. the full-f32 reference (bounds bf16 error).
        ref_f = jax.block_until_ready(
            _poly_conv_frame_ref(x, edge_index, edge_weight, bf16_dot=False))
        assert np.allclose(np.asarray(out), np.asarray(ref_f), rtol=6e-2, atol=6e-2), \
            "mismatch vs f32 reference"

    print("KERNEL_OK")
</pallas_src>

<mosaic_0001>
module attributes {stable_mosaic.version = 11 : i64} {
  func.func @kernel(%arg0: i32, %arg1: memref<128x128xbf16, #tpu.memory_space<vmem>>, %arg2: memref<1x128x32xf32, #tpu.memory_space<vmem>>, %arg3: memref<128x128xf32, #tpu.memory_space<vmem>>) attributes {dimension_semantics = [#tpu.dimension_semantics<parallel>], iteration_bounds = array<i64: 1>, scalar_prefetch = 0 : i64, scratch_operands = 0 : i64, tpu.core_type = #tpu.core_type<tc>, window_params = [{pipeline_mode = #tpu.pipeline_mode<synchronous>, transform_indices = @transform_0, window_bounds = array<i64: 128, 128>}, {transform_indices = @transform_1, window_bounds = array<i64: 1, 128, 32>}, {transform_indices = @transform_2, window_bounds = array<i64: 128, 128>}]} {
    %c0 = arith.constant 0 : index
    %c0_0 = arith.constant 0 : index
    %0 = vector.load %arg1[%c0, %c0_0] : memref<128x128xbf16, #tpu.memory_space<vmem>>, vector<128x128xbf16>
    %c0_1 = arith.constant 0 : index
    %c0_2 = arith.constant 0 : index
    %c0_3 = arith.constant 0 : index
    %1 = vector.load %arg2[%c0_1, %c0_2, %c0_3] : memref<1x128x32xf32, #tpu.memory_space<vmem>>, vector<1x128x32xf32>
    %2 = vector.shape_cast %1 : vector<1x128x32xf32> to vector<128x32xf32>
    %3 = arith.truncf %2 : vector<128x32xf32> to vector<128x32xbf16>
    %cst = arith.constant dense<0.000000e+00> : vector<128x32xf32>
    %4 = tpu.matmul %0, %3, %cst {dimension_numbers = #tpu.dot_dimension_numbers<[1], [0], [0], [1], [0, 0, 1, 1], [], []>} : vector<128x128xbf16>, vector<128x32xbf16>, vector<128x32xf32> -> vector<128x32xf32>
    %cst_4 = arith.constant 1.52318835 : f32
    %5 = vector.broadcast %cst_4 : f32 to vector<128x32xf32>
    %6 = arith.mulf %5, %4 : vector<128x32xf32>
    %cst_5 = arith.constant 0.000000e+00 : f32
    %7 = vector.broadcast %cst_5 : f32 to vector<128x32xf32>
    %8 = arith.mulf %7, %2 : vector<128x32xf32>
    %9 = arith.addf %6, %8 : vector<128x32xf32>
    %10 = arith.truncf %9 : vector<128x32xf32> to vector<128x32xbf16>
    %cst_6 = arith.constant dense<0.000000e+00> : vector<128x32xf32>
    %11 = tpu.matmul %0, %10, %cst_6 {dimension_numbers = #tpu.dot_dimension_numbers<[1], [0], [0], [1], [0, 0, 1, 1], [], []>} : vector<128x128xbf16>, vector<128x32xbf16>, vector<128x32xf32> -> vector<128x32xf32>
    %cst_7 = arith.constant 1.42798901 : f32
    %12 = vector.broadcast %cst_7 : f32 to vector<128x32xf32>
    %13 = arith.mulf %12, %11 : vector<128x32xf32>
    %cst_8 = arith.constant -0.000000e+00 : f32
    %14 = vector.broadcast %cst_8 : f32 to vector<128x32xf32>
    %15 = arith.mulf %14, %9 : vector<128x32xf32>
    %16 = arith.addf %13, %15 : vector<128x32xf32>
    %cst_9 = arith.constant -0.435019255 : f32
    %17 = vector.broadcast %cst_9 : f32 to vector<128x32xf32>
    %18 = arith.mulf %17, %2 : vector<128x32xf32>
    %19 = arith.addf %16, %18 : vector<128x32xf32>
    %20 = arith.truncf %19 : vector<128x32xf32> to vector<128x32xbf16>
    %cst_10 = arith.constant dense<0.000000e+00> : vector<128x32xf32>
    %21 = tpu.matmul %0, %20, %cst_10 {dimension_numbers = #tpu.dot_dimension_numbers<[1], [0], [0], [1], [0, 0, 1, 1], [], []>} : vector<128x128xbf16>, vector<128x32xbf16>, vector<128x32xf32> -> vector<128x32xf32>
    %cst_11 = arith.constant 1.42164242 : f32
    %22 = vector.broadcast %cst_11 : f32 to vector<128x32xf32>
    %23 = arith.mulf %22, %21 : vector<128x32xf32>
    %cst_12 = arith.constant -0.000000e+00 : f32
    %24 = vector.broadcast %cst_12 : f32 to vector<128x32xf32>
    %25 = arith.mulf %24, %19 : vector<128x32xf32>
    %26 = arith.addf %23, %25 : vector<128x32xf32>
    %cst_13 = arith.constant -0.46402052 : f32
    %27 = vector.broadcast %cst_13 : f32 to vector<128x32xf32>
    %28 = arith.mulf %27, %9 : vector<128x32xf32>
    %29 = arith.addf %26, %28 : vector<128x32xf32>
    %30 = tpu.concatenate %2, %9, %19, %29 in 1 : vector<128x32xf32>, vector<128x32xf32>, vector<128x32xf32>, vector<128x32xf32> -> vector<128x128xf32>
    %c0_14 = arith.constant 0 : index
    %c0_15 = arith.constant 0 : index
    %31 = vector.load %arg3[%c0_14, %c0_15] : memref<128x128xf32, #tpu.memory_space<vmem>>, vector<128x128xf32>
    tpu.vector_store %arg3[%c0_14, %c0_15], %30 {strides = array<i32>} : memref<128x128xf32, #tpu.memory_space<vmem>>, vector<128x128xf32>,
    return
  }
  func.func @transform_0(%arg0: i32) -> (i32, i32) {
    %c0_i32 = arith.constant 0 : i32
    %c0_i32_0 = arith.constant 0 : i32
    %c0_i32_1 = arith.constant 0 : i32
    return %c0_i32, %c0_i32_0 : i32, i32
  }
  func.func @transform_1(%arg0: i32) -> (i32, i32, i32) {
    %c0_i32 = arith.constant 0 : i32
    %c0_i32_0 = arith.constant 0 : i32
    %c0_i32_1 = arith.constant 0 : i32
    return %arg0, %c0_i32, %c0_i32_0 : i32, i32, i32
  }
  func.func @transform_2(%arg0: i32) -> (i32, i32) {
    %c0_i32 = arith.constant 0 : i32
    %c0_i32_0 = arith.constant 0 : i32
    return %c0_i32, %arg0 : i32, i32
  }
}

</mosaic_0001>

<bundles_post_ra>
// kernel: tpu_custom_call.1
= control target key start
LH: loop header
LB: loop body
LE: loop exit
PB: predicated region body
PF: predicated region fallthrough
CT: control target
= control target key end

     0   :  { %s1696_s0 = inlined_call_operand.vmem [shape: bf16[128,128], index: 0, kind: input, shape index: {}]   ;;  %s1697_s1 = inlined_call_operand.vmem [shape: f32[1,128,32], index: 1, kind: input, shape index: {}]   ;;  %s1698_s2 = inlined_call_operand.hbm [shape: f32[128,128], index: 2, kind: output, shape index: {}]  }
   0x1   :  { %v1124_v0 = vld [vmem:[%s1697_s1 + $0x70] sm:$0xff]  ;;  %v1129_v1 = vld [vmem:[%s1697_s1 + $0x78] sm:$0xff]  ;;  %v1134_v2 = vld [vmem:[%s1697_s1 + $0x60] sm:$0xff] }
   0x2   :  { %v52_v3 = vpack.c.bf16 %v1129_v1, %v1124_v0  ;;  %v1141_v4 = vld [vmem:[%s1697_s1 + $0x68] sm:$0xff]  ;;  %v1148_v6 = vld [vmem:[%s1697_s1 + $0x50] sm:$0xff]  ;;  %v1153_v7 = vld [vmem:[%s1697_s1 + $0x58] sm:$0xff] }
   0x3   :  { %v51_v5 = vpack.c.bf16 %v1141_v4, %v1134_v2  ;;  %v1158_v8 = vld [vmem:[%s1697_s1 + $0x40] sm:$0xff]  ;;  %v50_v9 = vpack.c.bf16 %v1153_v7, %v1148_v6  ;;  %v1165_v10 = vld [vmem:[%s1697_s1 + $0x48] sm:$0xff]  ;;  %v1175_v13 = vld [vmem:[%s1697_s1 + $0x30] sm:$0xff] }
   0x4   :  { %947 = vmatprep.subr.bf16.mxu0 %v52_v3  ;;  %1704 = vst [vmem:[#allocation5_spill] sm:$0xff] %v1158_v8  ;;  %v1065_v11 = vld [vmem:[%s1696_s0] sm:$0xff]   ;;  %v49_v12 = vpack.c.bf16 %v1165_v10, %v1158_v8  ;;  %1705 = vst [vmem:[#allocation6_spill] sm:$0xff] %v1175_v13  ;;  %v1180_v14 = vld [vmem:[%s1697_s1 + $0x38] sm:$0xff] }
   0x5   :  { %948 = vmatpush3.bf16.msra.mxu0 %v52_v3  ;;  %963 = vmatprep.mubr.bf16.mxu0 %v1065_v11  ;;  %1706 = vst [vmem:[#allocation7_spill] sm:$0xff] %v1180_v14  ;;  %v48_v15 = vpack.c.bf16 %v1180_v14, %v1175_v13 }
   0x6   :  { %949 = vmatprep.subr.bf16.mxu0 %v51_v5  ;;  %995 = vmatprep.mubr.bf16.mxu1 %v1065_v11 }
   0x9   :  { %950 = vmatpush3.bf16.msra.mxu0 %v51_v5 }
   0xa   :  { %951 = vmatprep.subr.bf16.mxu0 %v50_v9 }
   0xd   :  { %952 = vmatpush3.bf16.msra.mxu0 %v50_v9 }
   0xe   :  { %953 = vmatprep.subr.bf16.mxu0 %v49_v12 }
   0xf   :  { %7 = vsyncpa [#allocation3], 0  ;;  %v1187_v16 = vld [vmem:[%s1697_s1 + $0x20] sm:$0xff]  ;;  %v1192_v17 = vld [vmem:[%s1697_s1 + $0x28] sm:$0xff]  ;;  %v220_v50 = vmul.f32 0.0, %v1175_v13  ;;  %v221_v52 = vmul.f32 0.0, %v1180_v14 }
  0x10   :  { %1707 = vst [vmem:[#allocation8_spill] sm:$0xff] %v1187_v16  ;;  %1708 = vst [vmem:[#allocation9_spill] sm:$0xff] %v1192_v17  ;;  %v47_v18 = vpack.c.bf16 %v1192_v17, %v1187_v16  ;;  %v1199_v19 = vld [vmem:[%s1697_s1 + $0x10] sm:$0xff]  ;;  %v1204_v20 = vld [vmem:[%s1697_s1 + $0x18] sm:$0xff]  ;;  %v218_v56 = vmul.f32 0.0, %v1187_v16  ;;  %v219_v61 = vmul.f32 0.0, %v1192_v17 }
  0x11   :  { %954 = vmatpush3.bf16.msra.mxu0 %v49_v12  ;;  %v46_v21 = vpack.c.bf16 %v1204_v20, %v1199_v19  ;;  %v1211_v22 = vld [vmem:[%s1697_s1] sm:$0xff]  ;;  %v1216_v23 = vld [vmem:[%s1697_s1 + $0x8] sm:$0xff]  ;;  %v1228_v26 = vld [vmem:[%s1696_s0 + $0x10] sm:$0xff]   ;;  %v216_v32 = vmul.f32 0.0, %v1199_v19  ;;  %v217_v39 = vmul.f32 0.0, %v1204_v20  ;;  %v224_v5 = vmul.f32 0.0, %v1148_v6 }
  0x12   :  { %955 = vmatprep.subr.bf16.mxu0 %v48_v15  ;;  %v45_v24 = vpack.c.bf16 %v1216_v23, %v1211_v22  ;;  %v1223_v25 = vld [vmem:[%s1696_s0 + $0x8] sm:$0xff]   ;;  %v1235_v27 = vld [vmem:[%s1696_s0 + $0x18] sm:$0xff]   ;;  %v1240_v28 = vld [vmem:[%s1696_s0 + $0x20] sm:$0xff]   ;;  %v214_v35 = vmul.f32 0.0, %v1211_v22  ;;  %v215_v43 = vmul.f32 0.0, %v1216_v23  ;;  %v225_v12 = vmul.f32 0.0, %v1153_v7 }
  0x13   :  { %v1247_v29 = vld [vmem:[%s1696_s0 + $0x28] sm:$0xff]   ;;  %v1252_v30 = vld [vmem:[%s1696_s0 + $0x30] sm:$0xff]   ;;  %v1259_v31 = vld [vmem:[%s1696_s0 + $0x38] sm:$0xff]   ;;  %s1100_s0 = smov 32   ;;  %s1101_s29 = smov 64   ;;  %vm808_vm0 = vcmask 261120  }
  0x14   :  { %s1102_s30 = smov 96   ;;  %vm825_vm1 = vcmask 523264   ;;  %vm842_vm2 = vcmask 785408   ;;  %s1103_s11 = smov [#allocation2]  }
  0x15   :  { %956 = vmatpush3.bf16.msra.mxu0 %v48_v15  ;;  %s880_s12 = sshll.u32 %s1103_s11, 4  ;;  %s881_s12 = int_to_ptr.vmem [resolvable:$true] %s880_s12 }
  0x16   :  { %957 = vmatprep.subr.bf16.mxu0 %v47_v18  ;;  %s1078_s15 = scalar_lea.vmem %s881_s12, 2048  ;;  %p1083_p1 = scmp.lt.s32.totalorder %s881_s12, %s881_s12 }
  0x17   :  { %p1079_p0 = scmp.ne.s32.totalorder %s881_s12, %s1078_s15  ;;  %p1084_p2 = scmp.lt.s32.totalorder %s1078_s15, %s1078_s15 }
  0x19   :  { %958 = vmatpush3.bf16.msra.mxu0 %v47_v18  ;;  %p1085_p3 = por %p1084_p2, %p1083_p1 }
  0x1a   :  { %959 = vmatprep.subr.bf16.mxu0 %v46_v21 }
  0x1b   :  { %p1086_p4 = pnand %p1085_p3, %p1079_p0 }
  0x1d   :  { %960 = vmatpush3.bf16.msra.mxu0 %v46_v21 }
  0x1e   :  { %961 = vmatprep.subr.bf16.mxu0 %v45_v24 }
  0x21   :  { %962 = vmatpush3.bf16.msra.mxu0 %v45_v24  ;;  %v222_v24 = vmul.f32 0.0, %v1158_v8 }
  0x24   :  { %964 = vmatmul.mubr.bf16.vlgmr.msra.gmra.mxu0 %v1223_v25 }
  0x25   :  { %967 = vmatprep.mubr.bf16.mxu0 %v1228_v26 }
  0x2c   :  { %968 = vmatmul.mubr.bf16.gmra.mxu0 %v1235_v27 }
  0x2d   :  { %971 = vmatprep.mubr.bf16.mxu0 %v1240_v28 }
  0x34   :  { %972 = vmatmul.mubr.bf16.gmra.mxu0 %v1247_v29 }
  0x35   :  { %975 = vmatprep.mubr.bf16.mxu0 %v1252_v30 }
  0x3c   :  { %976 = vmatmul.mubr.bf16.gmra.mxu0 %v1259_v31 }
  0x3d   :  { %1027 = vmatprep.mubr.bf16.mxu0 %v1065_v11 }
  0xe4   :  { %v965_v33 = vpop.f32.mrf.mxu0 }
  0xe5   :  { %v200_v34 = vmul.f32 1.5231884, %v965_v33 }
  0xe6   :  { %v135_v36 = vpop.f32.mrf.mxu0 }
  0xe7   :  { %v1264_v37 = vadd.f32 %v216_v32, %v200_v34  ;;  %v198_v38 = vmul.f32 1.5231884, %v135_v36  ;;  %v223_v36 = vmul.f32 0.0, %v1165_v10 }
  0xe8   :  { %v966_v40 = vpop.f32.mrf.mxu0 }
  0xe9   :  { %v1267_v41 = vadd.f32 %v214_v35, %v198_v38  ;;  %v201_v42 = vmul.f32 1.5231884, %v966_v40  ;;  %636 = vrot.lane.b32.xlu1 %v1264_v37, %s1100_s0 }
  0xea   :  { %v138_v44 = vpop.f32.mrf.mxu0 }
  0xeb   :  { %v1272_v45 = vadd.f32 %v217_v39, %v201_v42  ;;  %v199_v46 = vmul.f32 1.5231884, %v138_v44  ;;  %632 = vrot.lane.b32.xlu0 %v1267_v41, %s1100_s0  ;;  %v228_v42 = vmul.f32 0.0, %v1124_v0 }
  0xec   :  { %v969_v47 = vpop.f32.mrf.mxu0 }
  0xed   :  { %v1276_v48 = vadd.f32 %v215_v43, %v199_v46  ;;  %v204_v49 = vmul.f32 1.5231884, %v969_v47  ;;  %638 = vrot.lane.b32.xlu1 %v1272_v45, %s1100_s0  ;;  %v229_v46 = vmul.f32 0.0, %v1129_v1  ;;  %v226_v47 = vmul.f32 0.0, %v1134_v2 }
  0xee   :  { %v151_v51 = vpop.f32.mrf.mxu0 }
  0xef   :  { %634 = vrot.lane.b32.xlu0 %v1276_v48, %s1100_s0  ;;  %v1284_v54 = vadd.f32 %v220_v50, %v204_v49  ;;  %v202_v55 = vmul.f32 1.5231884, %v151_v51 }
  0xf0   :  { %v970_v53 = vpop.f32.mrf.mxu0 }
  0xf1   :  { %v205_v57 = vmul.f32 1.5231884, %v970_v53  ;;  %v1292_v63 = vadd.f32 %v218_v56, %v202_v55  ;;  %v227_v53 = vmul.f32 0.0, %v1141_v4 }
  0xf2   :  { %v154_v58 = vpop.f32.mrf.mxu0 }
  0xf3   :  { %v1287_v59 = vadd.f32 %v221_v52, %v205_v57  ;;  %v203_v60 = vmul.f32 1.5231884, %v154_v58  ;;  %644 = vrot.lane.b32.xlu0 %v1284_v54, %s1100_s0 }
  0xf4   :  { %v973_v62 = vpop.f32.mrf.mxu0 }
  0xf5   :  { %v208_v3 = vmul.f32 1.5231884, %v973_v62  ;;  %646 = vrot.lane.b32.xlu1 %v1287_v59, %s1100_s0  ;;  %v1297_v11 = vadd.f32 %v219_v61, %v203_v60 }
  0xf6   :  { %v167_v9 = vpop.f32.mrf.mxu0 }
  0xf7   :  { %640 = vrot.lane.b32.xlu0 %v1292_v63, %s1100_s0  ;;  %v1302_v18 = vadd.f32 %v224_v5, %v208_v3  ;;  %v206_v21 = vmul.f32 1.5231884, %v167_v9  ;;  %v249_v9 = vpack.c.bf16 %v1287_v59, %v1284_v54 }
  0xf8   :  { %v974_v15 = vpop.f32.mrf.mxu0 }
  0xf9   :  { %v209_v32 = vmul.f32 1.5231884, %v974_v15  ;;  %642 = vrot.lane.b32.xlu1 %v1297_v11, %s1100_s0  ;;  %v1312_v39 = vadd.f32 %v222_v24, %v206_v21  ;;  %v247_v15 = vpack.c.bf16 %v1272_v45, %v1264_v37  ;;  %v246_v21 = vpack.c.bf16 %v1276_v48, %v1267_v41 }
  0xfa   :  { %v170_v33 = vpop.f32.mrf.mxu0 }
  0xfb   :  { %v1307_v34 = vadd.f32 %v225_v12, %v209_v32  ;;  %v207_v35 = vmul.f32 1.5231884, %v170_v33  ;;  %652 = vrot.lane.b32.xlu0 %v1302_v18, %s1100_s0  ;;  %v248_v12 = vpack.c.bf16 %v1297_v11, %v1292_v63  ;;  %v369_v33 = vmul.f32 -0.0, %v1264_v37 }
  0xfc   :  { %v977_v38 = vpop.f32.mrf.mxu0 }
  0xfd   :  { %v212_v40 = vmul.f32 1.5231884, %v977_v38  ;;  %654 = vrot.lane.b32.xlu1 %v1307_v34, %s1100_s0  ;;  %v1317_v44 = vadd.f32 %v223_v36, %v207_v35  ;;  %v251_v3 = vpack.c.bf16 %v1307_v34, %v1302_v18  ;;  %v401_v35 = vmul.f32 -0.43501925, %v1199_v19 }
  0xfe   :  { %v183_v43 = vpop.f32.mrf.mxu0 }
  0xff   :  { %648 = vrot.lane.b32.xlu0 %v1312_v39, %s1100_s0  ;;  %v1323_v50 = vadd.f32 %v228_v42, %v212_v40  ;;  %v210_v51 = vmul.f32 1.5231884, %v183_v43  ;;  %v250_v5 = vpack.c.bf16 %v1317_v44, %v1312_v39  ;;  %v367_v42 = vmul.f32 -0.0, %v1267_v41 }
 0x100   :  { %v978_v49 = vpop.f32.mrf.mxu0 }
 0x101   :  { %v213_v52 = vmul.f32 1.5231884, %v978_v49  ;;  %650 = vrot.lane.b32.xlu1 %v1317_v44, %s1100_s0  ;;  %v1332_v58 = vadd.f32 %v226_v47, %v210_v51  ;;  %v399_v47 = vmul.f32 -0.43501925, %v1211_v22 }
 0x102   :  { %v186_v55 = vpop.f32.mrf.mxu0 }
 0x103   :  { %v1328_v56 = vadd.f32 %v229_v46, %v213_v52  ;;  %v211_v57 = vmul.f32 1.5231884, %v186_v55  ;;  %660 = vrot.lane.b32.xlu0 %v1323_v50, %s1100_s0  ;;  %v370_v46 = vmul.f32 -0.0, %v1272_v45 }
 0x105   :  { %v1334_v60 = vadd.f32 %v227_v53, %v211_v57  ;;  %662 = vrot.lane.b32.xlu1 %v1328_v56, %s1100_s0  ;;  %v253_v61 = vpack.c.bf16 %v1328_v56, %v1323_v50 }
 0x107   :  { %656 = vrot.lane.b32.xlu0 %v1332_v58, %s1100_s0  ;;  %979 = vmatprep.subr.bf16.mxu1 %v253_v61  ;;  %v252_v62 = vpack.c.bf16 %v1334_v60, %v1332_v58 }
 0x108   :  { %980 = vmatpush3.bf16.msra.mxu1 %v253_v61  ;;  %v368_v61 = vmul.f32 -0.0, %v1276_v48 }
 0x109   :  { %658 = vrot.lane.b32.xlu1 %v1334_v60, %s1100_s0  ;;  %981 = vmatprep.subr.bf16.mxu1 %v252_v62 }
 0x10c   :  { %982 = vmatpush3.bf16.msra.mxu1 %v252_v62  ;;  %v400_v62 = vmul.f32 -0.43501925, %v1216_v23 }
 0x10d   :  { %983 = vmatprep.subr.bf16.mxu1 %v251_v3 }
 0x110   :  { %984 = vmatpush3.bf16.msra.mxu1 %v251_v3 }
 0x111   :  { %985 = vmatprep.subr.bf16.mxu1 %v250_v5 }
 0x114   :  { %986 = vmatpush3.bf16.msra.mxu1 %v250_v5  ;;  %v373_v5 = vmul.f32 -0.0, %v1284_v54 }
 0x115   :  { %987 = vmatprep.subr.bf16.mxu1 %v249_v9 }
 0x118   :  { %988 = vmatpush3.bf16.msra.mxu1 %v249_v9  ;;  %v405_v9 = vmul.f32 -0.43501925, %v1175_v13 }
 0x119   :  { %989 = vmatprep.subr.bf16.mxu1 %v248_v12 }
 0x11c   :  { %990 = vmatpush3.bf16.msra.mxu1 %v248_v12 }
 0x11d   :  { %991 = vmatprep.subr.bf16.mxu1 %v247_v15 }
 0x120   :  { %992 = vmatpush3.bf16.msra.mxu1 %v247_v15 }
 0x121   :  { %993 = vmatprep.subr.bf16.mxu1 %v246_v21 }
 0x124   :  { %994 = vmatpush3.bf16.msra.mxu1 %v246_v21 }
 0x127   :  { %996 = vmatmul.mubr.bf16.vlgmr.msra.gmra.mxu1 %v1223_v25 }
 0x128   :  { %999 = vmatprep.mubr.bf16.mxu1 %v1228_v26 }
 0x12f   :  { %1000 = vmatmul.mubr.bf16.gmra.mxu1 %v1235_v27 }
 0x130   :  { %1003 = vmatprep.mubr.bf16.mxu1 %v1240_v28 }
 0x137   :  { %1004 = vmatmul.mubr.bf16.gmra.mxu1 %v1247_v29 }
 0x138   :  { %1007 = vmatprep.mubr.bf16.mxu1 %v1252_v30 }
 0x13f   :  { %1008 = vmatmul.mubr.bf16.gmra.mxu1 %v1259_v31 }
 0x140   :  { %1035 = vmatprep.mubr.bf16.mxu1 %v1240_v28  ;;  %v402_v28 = vmul.f32 -0.43501925, %v1204_v20 }
 0x1e7   :  { %v997_v24 = vpop.f32.mrf.mxu1 }
 0x1e8   :  { %v353_v32 = vmul.f32 1.427989, %v997_v24 }
 0x1e9   :  { %v288_v36 = vpop.f32.mrf.mxu1 }
 0x1ea   :  { %v385_v38 = vadd.f32 %v369_v33, %v353_v32  ;;  %v351_v40 = vmul.f32 1.427989, %v288_v36  ;;  %v371_v33 = vmul.f32 -0.0, %v1292_v63 }
 0x1eb   :  { %v998_v43 = vpop.f32.mrf.mxu1 }
 0x1ec   :  { %v383_v49 = vadd.f32 %v367_v42, %v351_v40  ;;  %v354_v51 = vmul.f32 1.427989, %v998_v43  ;;  %v1371_v52 = vadd.f32 %v401_v35, %v385_v38  ;;  %v374_v43 = vmul.f32 -0.0, %v1287_v59 }
 0x1ed   :  { %v291_v53 = vpop.f32.mrf.mxu1 }
 0x1ee   :  { %v386_v55 = vadd.f32 %v370_v46, %v354_v51  ;;  %v352_v57 = vmul.f32 1.427989, %v291_v53  ;;  %700 = vrot.lane.b32.xlu0 %v1371_v52, %s1101_s29  ;;  %v1380_v21 = vadd.f32 %v399_v47, %v383_v49  ;;  %v403_v46 = vmul.f32 -0.43501925, %v1187_v16 }
 0x1ef   :  { %v1001_v3 = vpop.f32.mrf.mxu1  ;;  %v406_v47 = vmul.f32 -0.43501925, %v1180_v14 }
 0x1f0   :  { %v384_v12 = vadd.f32 %v368_v61, %v352_v57  ;;  %v357_v15 = vmul.f32 1.427989, %v1001_v3  ;;  %v1382_v24 = vadd.f32 %v402_v28, %v386_v55  ;;  %v404_v3 = vmul.f32 -0.43501925, %v1192_v17 }
 0x1f1   :  { %v304_v32 = vpop.f32.mrf.mxu1  ;;  %v376_v17 = vmul.f32 -0.0, %v1317_v44 }
 0x1f2   :  { %v389_v35 = vadd.f32 %v373_v5, %v357_v15  ;;  %v355_v36 = vmul.f32 1.427989, %v304_v32  ;;  %696 = vrot.lane.b32.xlu0 %v1380_v21, %s1101_s29  ;;  %702 = vrot.lane.b32.xlu1 %v1382_v24, %s1101_s29  ;;  %v1389_v38 = vadd.f32 %v400_v62, %v384_v12  ;;  %v1393_v40 = vpack.c.bf16 %v1382_v24, %v1371_v52 }
 0x1f3   :  { %v1002_v42 = vpop.f32.mrf.mxu1  ;;  %v372_v62 = vmul.f32 -0.0, %v1297_v11  ;;  %v409_v12 = vmul.f32 -0.43501925, %v1148_v6 }
 0x1f4   :  { %v387_v49 = vadd.f32 %v371_v33, %v355_v36  ;;  %v358_v51 = vmul.f32 1.427989, %v1002_v42  ;;  %v1398_v28 = vadd.f32 %v405_v9, %v389_v35  ;;  %v1402_v53 = vpack.c.bf16 %v1389_v38, %v1380_v21 }
 0x1f5   :  { %v307_v55 = vpop.f32.mrf.mxu1  ;;  %v377_v9 = vmul.f32 -0.0, %v1302_v18  ;;  %v375_v42 = vmul.f32 -0.0, %v1312_v39 }
 0x1f6   :  { %v390_v57 = vadd.f32 %v374_v43, %v358_v51  ;;  %v356_v61 = vmul.f32 1.427989, %v307_v55  ;;  %698 = vrot.lane.b32.xlu1 %v1389_v38, %s1101_s29  ;;  %708 = vrot.lane.b32.xlu0 %v1398_v28, %s1101_s29  ;;  %v1412_v33 = vadd.f32 %v403_v46, %v387_v49  ;;  %v407_v49 = vmul.f32 -0.43501925, %v1158_v8 }
 0x1f7   :  { %v1005_v5 = vpop.f32.mrf.mxu1 }
 0x1f8   :  { %v388_v15 = vadd.f32 %v372_v62, %v356_v61  ;;  %v361_v32 = vmul.f32 1.427989, %v1005_v5  ;;  %v1414_v35 = vadd.f32 %v406_v47, %v390_v57  ;;  %v378_v47 = vmul.f32 -0.0, %v1307_v34 }
 0x1f9   :  { %v320_v36 = vpop.f32.mrf.mxu1  ;;  %v410_v57 = vmul.f32 -0.43501925, %v1153_v7 }
 0x1fa   :  { %v393_v43 = vadd.f32 %v377_v9, %v361_v32  ;;  %v359_v51 = vmul.f32 1.427989, %v320_v36  ;;  %704 = vrot.lane.b32.xlu0 %v1412_v33, %s1101_s29  ;;  %710 = vrot.lane.b32.xlu1 %v1414_v35, %s1101_s29  ;;  %v1421_v55 = vadd.f32 %v404_v3, %v388_v15  ;;  %v1425_v61 = vpack.c.bf16 %v1414_v35, %v1398_v28 }
 0x1fb   :  { %v1006_v46 = vpop.f32.mrf.mxu1 }
 0x1fc   :  { %v391_v62 = vadd.f32 %v375_v42, %v359_v51  ;;  %v362_v5 = vmul.f32 1.427989, %v1006_v46  ;;  %v1430_v9 = vadd.f32 %v409_v12, %v393_v43  ;;  %v1434_v32 = vpack.c.bf16 %v1421_v55, %v1412_v33 }
 0x1fd   :  { %v323_v3 = vpop.f32.mrf.mxu1  ;;  %v408_v42 = vmul.f32 -0.43501925, %v1165_v10  ;;  %v381_v12 = vmul.f32 -0.0, %v1323_v50  ;;  %v413_v43 = vmul.f32 -0.43501925, %v1124_v0 }
 0x1fe   :  { %v394_v15 = vadd.f32 %v378_v47, %v362_v5  ;;  %v360_v36 = vmul.f32 1.427989, %v323_v3  ;;  %706 = vrot.lane.b32.xlu1 %v1421_v55, %s1101_s29  ;;  %716 = vrot.lane.b32.xlu0 %v1430_v9, %s1101_s29  ;;  %v1444_v14 = vadd.f32 %v407_v49, %v391_v62  ;;  %v379_v3 = vmul.f32 -0.0, %v1332_v58 }
 0x1ff   :  { %v1009_v51 = vpop.f32.mrf.mxu1  ;;  %v382_v49 = vmul.f32 -0.0, %v1328_v56  ;;  %v414_v62 = vmul.f32 -0.43501925, %v1129_v1  ;;  %v412_v1 = vmul.f32 -0.43501925, %v1141_v4 }
 0x200   :  { %v392_v46 = vadd.f32 %v376_v17, %v360_v36  ;;  %v365_v16 = vmul.f32 1.427989, %v1009_v51  ;;  %v1446_v47 = vadd.f32 %v410_v57, %v394_v15  ;;  %v411_v57 = vmul.f32 -0.43501925, %v1134_v2 }
 0x201   :  { %v336_v5 = vpop.f32.mrf.mxu1 }
 0x202   :  { %v397_v13 = vadd.f32 %v381_v12, %v365_v16  ;;  %v363_v8 = vmul.f32 1.427989, %v336_v5  ;;  %712 = vrot.lane.b32.xlu0 %v1444_v14, %s1101_s29  ;;  %718 = vrot.lane.b32.xlu1 %v1446_v47, %s1101_s29  ;;  %v1453_v10 = vadd.f32 %v408_v42, %v392_v46  ;;  %v436_v0 = vpack.c.bf16 %v1446_v47, %v1430_v9 }
 0x203   :  { %v1010_v17 = vpop.f32.mrf.mxu1  ;;  %v380_v5 = vmul.f32 -0.0, %v1334_v60 }
 0x204   :  { %v395_v16 = vadd.f32 %v379_v3, %v363_v8  ;;  %v366_v15 = vmul.f32 1.427989, %v1010_v17  ;;  %v1460_v36 = vadd.f32 %v413_v43, %v397_v13  ;;  %v435_v51 = vpack.c.bf16 %v1453_v10, %v1444_v14 }
 0x205   :  { %v339_v12 = vpop.f32.mrf.mxu1 }
 0x206   :  { %v398_v42 = vadd.f32 %v382_v49, %v366_v15  ;;  %v364_v46 = vmul.f32 1.427989, %v339_v12  ;;  %714 = vrot.lane.b32.xlu1 %v1453_v10, %s1101_s29  ;;  %724 = vrot.lane.b32.xlu0 %v1460_v36, %s1101_s29  ;;  %v1470_v8 = vadd.f32 %v411_v57, %v395_v16  ;;  %v593_v57 = vmul.f32 -0.46402052, %v1317_v44 }
 0x208   :  { %v396_v2 = vadd.f32 %v380_v5, %v364_v46  ;;  %v1472_v13 = vadd.f32 %v414_v62, %v398_v42  ;;  %v553_v5 = vmul.f32 -0.0, %v1389_v38 }
 0x20a   :  { %720 = vrot.lane.b32.xlu0 %v1470_v8, %s1101_s29  ;;  %726 = vrot.lane.b32.xlu1 %v1472_v13, %s1101_s29  ;;  %v438_v43 = vpack.c.bf16 %v1472_v13, %v1460_v36  ;;  %v1480_v3 = vadd.f32 %v412_v1, %v396_v2  ;;  %v561_v2 = vmul.f32 -0.0, %v1453_v10 }
 0x20c   :  { %1011 = vmatprep.subr.bf16.mxu0 %v438_v43  ;;  %1043 = vmatprep.subr.bf16.mxu1 %v438_v43  ;;  %v437_v4 = vpack.c.bf16 %v1480_v3, %v1470_v8 }
 0x20d   :  { %1012 = vmatpush3.bf16.msra.mxu0 %v438_v43  ;;  %1051 = vmatpush3.bf16.msra.mxu1 %v438_v43 }
 0x20e   :  { %722 = vrot.lane.b32.xlu1 %v1480_v3, %s1101_s29  ;;  %1013 = vmatprep.subr.bf16.mxu0 %v437_v4 }
 0x20f   :  { %1044 = vmatprep.subr.bf16.mxu1 %v437_v4 }
 0x211   :  { %1014 = vmatpush3.bf16.msra.mxu0 %v437_v4  ;;  %1052 = vmatpush3.bf16.msra.mxu1 %v437_v4 }
 0x212   :  { %1015 = vmatprep.subr.bf16.mxu0 %v436_v0  ;;  %1045 = vmatprep.subr.bf16.mxu1 %v436_v0 }
 0x215   :  { %1016 = vmatpush3.bf16.msra.mxu0 %v436_v0  ;;  %1053 = vmatpush3.bf16.msra.mxu1 %v436_v0 }
 0x216   :  { %1017 = vmatprep.subr.bf16.mxu0 %v435_v51  ;;  %1046 = vmatprep.subr.bf16.mxu1 %v435_v51 }
 0x219   :  { %1018 = vmatpush3.bf16.msra.mxu0 %v435_v51  ;;  %1054 = vmatpush3.bf16.msra.mxu1 %v435_v51 }
 0x21a   :  { %1019 = vmatprep.subr.bf16.mxu0 %v1425_v61  ;;  %1047 = vmatprep.subr.bf16.mxu1 %v1425_v61 }
 0x21d   :  { %1020 = vmatpush3.bf16.msra.mxu0 %v1425_v61  ;;  %1055 = vmatpush3.bf16.msra.mxu1 %v1425_v61  ;;  %v587_v61 = vmul.f32 -0.46402052, %v1272_v45 }
 0x21e   :  { %1021 = vmatprep.subr.bf16.mxu0 %v1434_v32  ;;  %1048 = vmatprep.subr.bf16.mxu1 %v1434_v32 }
 0x221   :  { %1022 = vmatpush3.bf16.msra.mxu0 %v1434_v32  ;;  %1056 = vmatpush3.bf16.msra.mxu1 %v1434_v32  ;;  %v584_v32 = vmul.f32 -0.46402052, %v1267_v41  ;;  %v592_v41 = vmul.f32 -0.46402052, %v1312_v39 }
 0x222   :  { %1023 = vmatprep.subr.bf16.mxu0 %v1393_v40  ;;  %1049 = vmatprep.subr.bf16.mxu1 %v1393_v40 }
 0x225   :  { %1024 = vmatpush3.bf16.msra.mxu0 %v1393_v40  ;;  %1057 = vmatpush3.bf16.msra.mxu1 %v1393_v40  ;;  %v586_v40 = vmul.f32 -0.46402052, %v1264_v37  ;;  %v595_v37 = vmul.f32 -0.46402052, %v1307_v34 }
 0x226   :  { %1025 = vmatprep.subr.bf16.mxu0 %v1402_v53  ;;  %1050 = vmatprep.subr.bf16.mxu1 %v1402_v53 }
 0x229   :  { %1026 = vmatpush3.bf16.msra.mxu0 %v1402_v53  ;;  %1058 = vmatpush3.bf16.msra.mxu1 %v1402_v53  ;;  %v1512_v53 = vmul.f32 -0.46402052, %v1276_v48  ;;  %v554_v48 = vmul.f32 -0.0, %v1371_v52  ;;  %v555_v52 = vmul.f32 -0.0, %v1382_v24 }
 0x22c   :  { %1028 = vmatmul.mubr.bf16.vlgmr.msra.gmra.mxu0 %v1223_v25  ;;  %1036 = vmatmul.mubr.bf16.vlgmr.msra.gmra.mxu1 %v1247_v29  ;;  %v1515_v25 = vmul.f32 -0.46402052, %v1284_v54  ;;  %v1521_v29 = vmul.f32 -0.46402052, %v1287_v59  ;;  %v562_v54 = vmul.f32 -0.0, %v1430_v9  ;;  %v560_v59 = vmul.f32 -0.0, %v1444_v14 }
 0x22d   :  { %1031 = vmatprep.mubr.bf16.mxu0 %v1228_v26  ;;  %1039 = vmatprep.mubr.bf16.mxu1 %v1252_v30  ;;  %v1518_v26 = vmul.f32 -0.46402052, %v1292_v63  ;;  %v552_v63 = vmul.f32 -0.0, %v1380_v21  ;;  %v563_v9 = vmul.f32 -0.0, %v1446_v47  ;;  %v1537_v21 = vmul.f32 -0.46402052, %v1332_v58 }
 0x22e   :  { %v1540_v14 = vmul.f32 -0.46402052, %v1328_v56 }
 0x234   :  { %1032 = vmatmul.mubr.bf16.gmra.mxu0 %v1235_v27  ;;  %1040 = vmatmul.mubr.bf16.gmra.mxu1 %v1259_v31  ;;  %v594_v31 = vmul.f32 -0.46402052, %v1302_v18  ;;  %v1532_v18 = vmul.f32 -0.46402052, %v1323_v50 }
 0x2ec   :  { %v1029_v27 = vpop.f32.mrf.mxu0  ;;  %v1037_v30 = vpop.f32.mrf.mxu1 }
 0x2ed   :  { %v538_v45 = vmul.f32 1.4216424, %v1029_v27  ;;  %v546_v0 = vmul.f32 1.4216424, %v1037_v30  ;;  %v558_v30 = vmul.f32 -0.0, %v1398_v28 }
 0x2ee   :  { %v473_v17 = vpop.f32.mrf.mxu0  ;;  %v505_v49 = vpop.f32.mrf.mxu1 }
 0x2ef   :  { %v570_v34 = vadd.f32 %v554_v48, %v538_v45  ;;  %v578_v62 = vadd.f32 %v562_v54, %v546_v0  ;;  %v536_v39 = vmul.f32 1.4216424, %v473_v17  ;;  %v544_v16 = vmul.f32 1.4216424, %v505_v49 }
 0x2f0   :  { %v1030_v15 = vpop.f32.mrf.mxu0  ;;  %v1038_v51 = vpop.f32.mrf.mxu1  ;;  %v566_v48 = vmul.f32 -0.0, %v1460_v36 }
 0x2f1   :  { %v568_v44 = vadd.f32 %v552_v63, %v536_v39  ;;  %v576_v12 = vadd.f32 %v560_v59, %v544_v16  ;;  %v539_v50 = vmul.f32 1.4216424, %v1030_v15  ;;  %v547_v42 = vmul.f32 1.4216424, %v1038_v51 }
 0x2f2   :  { %v476_v46 = vpop.f32.mrf.mxu0  ;;  %v508_v1 = vpop.f32.mrf.mxu1  ;;  %v602_v24 = vadd.f32 %v586_v40, %v570_v34  ;;  %v610_v43 = vadd.f32 %v594_v31, %v578_v62  ;;  %v556_v63 = vmul.f32 -0.0, %v1412_v33  ;;  %v564_v59 = vmul.f32 -0.0, %v1470_v8 }
 0x2f3   :  { %v571_v4 = vadd.f32 %v555_v52, %v539_v50  ;;  %v579_v47 = vadd.f32 %v563_v9, %v547_v42  ;;  %v537_v27 = vmul.f32 1.4216424, %v476_v46  ;;  %v545_v58 = vmul.f32 1.4216424, %v508_v1 }
 0x2f4   :  { %764 = vrot.lane.b32.xlu0 %v602_v24, %s1102_s30  ;;  %v1033_v56 = vpop.f32.mrf.mxu0  ;;  %v1041_v45 = vpop.f32.mrf.mxu1  ;;  %v600_v0 = vadd.f32 %v584_v32, %v568_v44  ;;  %v608_v38 = vadd.f32 %v592_v41, %v576_v12  ;;  %v559_v32 = vmul.f32 -0.0, %v1414_v35  ;;  %v567_v52 = vmul.f32 -0.0, %v1472_v13 }
 0x2f5   :  { %v569_v54 = vadd.f32 %v553_v5, %v537_v27  ;;  %v577_v17 = vadd.f32 %v561_v2, %v545_v58  ;;  %v542_v10 = vmul.f32 1.4216424, %v1033_v56  ;;  %v550_v40 = vmul.f32 1.4216424, %v1041_v45 }
 0x2f6   :  { %v489_v31 = vpop.f32.mrf.mxu0  ;;  %v521_v49 = vpop.f32.mrf.mxu1  ;;  %v603_v34 = vadd.f32 %v587_v61, %v571_v4  ;;  %v611_v62 = vadd.f32 %v595_v37, %v579_v47  ;;  %v557_v12 = vmul.f32 -0.0, %v1421_v55  ;;  %v565_v42 = vmul.f32 -0.0, %v1480_v3 }
 0x2f7   :  { %v574_v39 = vadd.f32 %v558_v30, %v542_v10  ;;  %v582_v16 = vadd.f32 %v566_v48, %v550_v40  ;;  %v540_v28 = vmul.f32 1.4216424, %v489_v31  ;;  %v548_v15 = vmul.f32 1.4216424, %v521_v49 }
 0x2f8   :  { %780 = vrot.lane.b32.xlu0 %v610_v43, %s1102_s30  ;;  %766 = vrot.lane.b32.xlu1 %v603_v34, %s1102_s30  ;;  %v1034_v36 = vpop.f32.mrf.mxu0  ;;  %v1042_v41 = vpop.f32.mrf.mxu1  ;;  %v601_v33 = vadd.f32 %v1512_v53, %v569_v54  ;;  %v609_v51 = vadd.f32 %v593_v57, %v577_v17  ;;  %v589_v53 = vmul.f32 -0.46402052, %v1297_v11  ;;  %v597_v57 = vmul.f32 -0.46402052, %v1334_v60 }
 0x2f9   :  { %v572_v8 = vadd.f32 %v556_v63, %v540_v28  ;;  %v580_v61 = vadd.f32 %v564_v59, %v548_v15  ;;  %v543_v37 = vmul.f32 1.4216424, %v1034_v36  ;;  %v551_v9 = vmul.f32 1.4216424, %v1042_v41  ;;  %v633_v11 = vpop.permute.xlu0 %632  ;;  %v637_v60 = vpop.permute.xlu1 %636 }
 0x2fa   :  { %v492_v44 = vpop.f32.mrf.mxu0  ;;  %v524_v50 = vpop.f32.mrf.mxu1  ;;  %v606_v46 = vadd.f32 %v1515_v25, %v574_v39  ;;  %v614_v35 = vadd.f32 %v1532_v18, %v582_v16 }
 0x2fb   :  { %v575_v5 = vadd.f32 %v559_v32, %v543_v37  ;;  %v583_v1 = vadd.f32 %v567_v52, %v551_v9  ;;  %v541_v13 = vmul.f32 1.4216424, %v492_v44  ;;  %v549_v2 = vmul.f32 1.4216424, %v524_v50 }
 0x2fc   :  { %760 = vrot.lane.b32.xlu0 %v600_v0, %s1102_s30  ;;  %782 = vrot.lane.b32.xlu1 %v611_v62, %s1102_s30  ;;  %v604_v55 = vadd.f32 %v1518_v26, %v572_v8  ;;  %v612_v3 = vadd.f32 %v1537_v21, %v580_v61  ;;  %v811_v52 = vsel %vm808_vm0, %v1199_v19, %v637_v60 }
 0x2fd   :  { %v573_v24 = vadd.f32 %v557_v12, %v541_v13  ;;  %v581_v25 = vadd.f32 %v565_v42, %v549_v2  ;;  %v607_v18 = vadd.f32 %v1521_v29, %v575_v5  ;;  %v615_v43 = vadd.f32 %v1540_v14, %v583_v1  ;;  %v635_v26 = vpop.permute.xlu0 %634  ;;  %v639_v29 = vpop.permute.xlu1 %638 }
 0x2fe   :  { %v812_v37 = vsel %vm808_vm0, %v1204_v20, %v639_v29 }
 0x2ff   :  { %v605_v4 = vadd.f32 %v589_v53, %v573_v24  ;;  %v613_v47 = vadd.f32 %v597_v57, %v581_v25  ;;  %v810_v57 = vsel %vm808_vm0, %v1216_v23, %v635_v26  ;;  %v1073_v23 = vld [vmem:[%s1697_s1 + $0x48] sm:$0xff] }
 0x300   :  { %776 = vrot.lane.b32.xlu0 %v608_v38, %s1102_s30  ;;  %762 = vrot.lane.b32.xlu1 %v601_v33, %s1102_s30 }
 0x301   :  { %v1577_v21 = vpop.permute.xlu0 %644  ;;  %v1579_v14 = vpop.permute.xlu1 %646 }
 0x304   :  { %778 = vrot.lane.b32.xlu1 %v609_v51, %s1102_s30  ;;  %772 = vrot.lane.b32.xlu0 %v606_v46, %s1102_s30 }
 0x305   :  { %v1581_v27 = vpop.permute.xlu0 %640  ;;  %v1583_v58 = vpop.permute.xlu1 %642 }
 0x308   :  { %768 = vrot.lane.b32.xlu0 %v604_v55, %s1102_s30  ;;  %774 = vrot.lane.b32.xlu1 %v607_v18, %s1102_s30  ;;  %v1709_v55 = vld [vmem:[#allocation5_spill] sm:$0xff] }
 0x309   :  { %v653_v56 = vpop.permute.xlu0 %652  ;;  %v655_v30 = vpop.permute.xlu1 %654 }
 0x30a   :  { %v819_v9 = vsel %vm808_vm0, %v1148_v6, %v653_v56  ;;  %v820_v20 = vsel %vm808_vm0, %v1153_v7, %v655_v30 }
 0x30c   :  { %784 = vrot.lane.b32.xlu0 %v612_v3, %s1102_s30  ;;  %770 = vrot.lane.b32.xlu1 %v605_v4, %s1102_s30  ;;  %v1710_v4 = vld [vmem:[#allocation6_spill] sm:$0xff] }
 0x30d   :  { %v649_v45 = vpop.permute.xlu0 %648  ;;  %v651_v48 = vpop.permute.xlu1 %650 }
 0x310   :  { %788 = vrot.lane.b32.xlu0 %v614_v35, %s1102_s30  ;;  %786 = vrot.lane.b32.xlu1 %v613_v47, %s1102_s30  ;;  %v809_v35 = vsel %vm808_vm0, %v1211_v22, %v633_v11  ;;  %v817_v22 = vsel %vm808_vm0, %v1709_v55, %v649_v45  ;;  %v815_v47 = vsel %vm808_vm0, %v1710_v4, %v1577_v21  ;;  %v1711_v21 = vld [vmem:[#allocation7_spill] sm:$0xff] }
 0x311   :  { %v1585_v0 = vpop.permute.xlu0 %660  ;;  %v1587_v38 = vpop.permute.xlu1 %662  ;;  %v818_v11 = vsel %vm808_vm0, %v1073_v23, %v651_v48 }
 0x314   :  { %790 = vrot.lane.b32.xlu1 %v615_v43, %s1102_s30 }
 0x315   :  { %v1589_v54 = vpop.permute.xlu0 %656  ;;  %v1591_v17 = vpop.permute.xlu1 %658 }
 0x319   :  { %v701_v10 = vpop.permute.xlu0 %700  ;;  %v703_v40 = vpop.permute.xlu1 %702 }
 0x31a   :  { %v828_v33 = vsel %vm825_vm1, %v811_v52, %v701_v10  ;;  %v829_v44 = vsel %vm825_vm1, %v812_v37, %v703_v40  ;;  %v816_v10 = vsel %vm808_vm0, %v1711_v21, %v1579_v14  ;;  %v1712_v40 = vld [vmem:[#allocation8_spill] sm:$0xff] }
 0x31b   :  { %v813_v48 = vsel %vm808_vm0, %v1712_v40, %v1581_v27  ;;  %v1074_v27 = vld [vmem:[%s1697_s1 + $0x60] sm:$0xff] }
 0x31d   :  { %v697_v31 = vpop.permute.xlu0 %696  ;;  %v699_v63 = vpop.permute.xlu1 %698 }
 0x31e   :  { %v826_v6 = vsel %vm825_vm1, %v809_v35, %v697_v31  ;;  %v827_v7 = vsel %vm825_vm1, %v810_v57, %v699_v63 }
 0x321   :  { %v709_v49 = vpop.permute.xlu0 %708  ;;  %v1593_v59 = vpop.permute.xlu1 %710 }
 0x322   :  { %v832_v60 = vsel %vm825_vm1, %v815_v47, %v709_v49  ;;  %v833_v63 = vsel %vm825_vm1, %v816_v10, %v1593_v59 }
 0x325   :  { %v705_v34 = vpop.permute.xlu0 %704  ;;  %v1595_v62 = vpop.permute.xlu1 %706 }
 0x326   :  { %v830_v31 = vsel %vm825_vm1, %v813_v48, %v705_v34  ;;  %v821_v34 = vsel %vm808_vm0, %v1074_v27, %v1589_v54 }
 0x329   :  { %v717_v39 = vpop.permute.xlu0 %716  ;;  %v719_v16 = vpop.permute.xlu1 %718 }
 0x32a   :  { %v836_v12 = vsel %vm825_vm1, %v819_v9, %v717_v39  ;;  %v837_v5 = vsel %vm825_vm1, %v820_v20, %v719_v16 }
 0x32d   :  { %v713_v28 = vpop.permute.xlu0 %712  ;;  %v715_v15 = vpop.permute.xlu1 %714 }
 0x32e   :  { %v834_v3 = vsel %vm825_vm1, %v817_v22, %v713_v28  ;;  %v835_v26 = vsel %vm825_vm1, %v818_v11, %v715_v15  ;;  %v1713_v15 = vld [vmem:[#allocation9_spill] sm:$0xff] }
 0x32f   :  { %v814_v14 = vsel %vm808_vm0, %v1713_v15, %v1583_v58  ;;  %v1075_v58 = vld [vmem:[%s1697_s1 + $0x70] sm:$0xff] }
 0x330   :  { %v831_v59 = vsel %vm825_vm1, %v814_v14, %v1595_v62  ;;  %v823_v54 = vsel %vm808_vm0, %v1075_v58, %v1585_v0  ;;  %v1076_v62 = vld [vmem:[%s1697_s1 + $0x68] sm:$0xff] }
 0x331   :  { %v1597_v36 = vpop.permute.xlu0 %724  ;;  %v1599_v32 = vpop.permute.xlu1 %726 }
 0x332   :  { %v840_v9 = vsel %vm825_vm1, %v823_v54, %v1597_v36 }
 0x335   :  { %v1601_v41 = vpop.permute.xlu0 %720  ;;  %v1606_v51 = vpop.permute.xlu1 %722 }
 0x336   :  { %v838_v52 = vsel %vm825_vm1, %v821_v34, %v1601_v41  ;;  %v822_v41 = vsel %vm808_vm0, %v1076_v62, %v1591_v17  ;;  %v1077_v17 = vld [vmem:[%s1697_s1 + $0x78] sm:$0xff] }
 0x337   :  { %v824_v36 = vsel %vm808_vm0, %v1077_v17, %v1587_v38 }
 0x366   :  { %v765_v8 = vpop.permute.xlu0 %764 }
 0x367   :  { %v845_v61 = vsel %vm842_vm2, %v828_v33, %v765_v8 }
 0x368   :  { %861 = vst [vmem:[#allocation2 + $0x10] sm:$0xff] %v845_v61 }
 0x36a   :  { %v781_v50 = vpop.permute.xlu0 %780  ;;  %v767_v19 = vpop.permute.xlu1 %766 }
 0x36b   :  { %v853_v42 = vsel %vm842_vm2, %v836_v12, %v781_v50  ;;  %v846_v46 = vsel %vm842_vm2, %v829_v44, %v767_v19  ;;  %v839_v44 = vsel %vm825_vm1, %v822_v41, %v1606_v51  ;;  %v841_v51 = vsel %vm825_vm1, %v824_v36, %v1599_v32 }
 0x36c   :  { %869 = vst [vmem:[#allocation2 + $0x50] sm:$0xff] %v853_v42  ;;  %862 = vst [vmem:[#allocation2 + $0x18] sm:$0xff] %v846_v46 }
 0x36e   :  { %v761_v1 = vpop.permute.xlu0 %760  ;;  %v783_v13 = vpop.permute.xlu1 %782 }
 0x36f   :  { %v843_v2 = vsel %vm842_vm2, %v826_v6, %v761_v1  ;;  %v854_v53 = vsel %vm842_vm2, %v837_v5, %v783_v13 }
 0x370   :  { %859 = vst [vmem:[#allocation2] sm:$0xff] %v843_v2  ;;  %870 = vst [vmem:[#allocation2 + $0x58] sm:$0xff] %v854_v53 }
 0x372   :  { %v777_v24 = vpop.permute.xlu0 %776  ;;  %v763_v25 = vpop.permute.xlu1 %762 }
 0x373   :  { %v851_v18 = vsel %vm842_vm2, %v834_v3, %v777_v24  ;;  %v844_v43 = vsel %vm842_vm2, %v827_v7, %v763_v25 }
 0x374   :  { %867 = vst [vmem:[#allocation2 + $0x40] sm:$0xff] %v851_v18  ;;  %860 = vst [vmem:[#allocation2 + $0x8] sm:$0xff] %v844_v43 }
 0x376   :  { %v779_v29 = vpop.permute.xlu1 %778  ;;  %v773_v56 = vpop.permute.xlu0 %772 }
 0x377   :  { %v852_v30 = vsel %vm842_vm2, %v835_v26, %v779_v29  ;;  %v849_v45 = vsel %vm842_vm2, %v832_v60, %v773_v56 }
 0x378   :  { %868 = vst [vmem:[#allocation2 + $0x48] sm:$0xff] %v852_v30  ;;  %865 = vst [vmem:[#allocation2 + $0x30] sm:$0xff] %v849_v45 }
 0x37a   :  { %v769_v49 = vpop.permute.xlu0 %768  ;;  %v775_v39 = vpop.permute.xlu1 %774 }
 0x37b   :  { %v847_v16 = vsel %vm842_vm2, %v830_v31, %v769_v49  ;;  %v850_v28 = vsel %vm842_vm2, %v833_v63, %v775_v39 }
 0x37c   :  { %863 = vst [vmem:[#allocation2 + $0x20] sm:$0xff] %v847_v16  ;;  %866 = vst [vmem:[#allocation2 + $0x38] sm:$0xff] %v850_v28 }
 0x37e   :  { %v785_v33 = vpop.permute.xlu0 %784  ;;  %v771_v8 = vpop.permute.xlu1 %770 }
 0x37f   :  { %v855_v61 = vsel %vm842_vm2, %v838_v52, %v785_v33  ;;  %v848_v37 = vsel %vm842_vm2, %v831_v59, %v771_v8 }
 0x380   :  { %871 = vst [vmem:[#allocation2 + $0x60] sm:$0xff] %v855_v61  ;;  %864 = vst [vmem:[#allocation2 + $0x28] sm:$0xff] %v848_v37 }
 0x382   :  { %v789_v12 = vpop.permute.xlu0 %788  ;;  %v787_v50 = vpop.permute.xlu1 %786 }
 0x383   :  { %v857_v19 = vsel %vm842_vm2, %v840_v9, %v789_v12  ;;  %v856_v0 = vsel %vm842_vm2, %v839_v44, %v787_v50 }
 0x384   :  { %873 = vst [vmem:[#allocation2 + $0x70] sm:$0xff] %v857_v19  ;;  %872 = vst [vmem:[#allocation2 + $0x68] sm:$0xff] %v856_v0 }
 0x386   :  { %v791_v42 = vpop.permute.xlu1 %790 }
 0x387   :  { %v858_v46 = vsel %vm842_vm2, %v841_v51, %v791_v42 }
 0x388   :  { %874 = vst [vmem:[#allocation2 + $0x78] sm:$0xff] %v858_v46 }
 0x389   :  { %1089 = shalt.err (!%p1086_p4)
}
 0x38a   :  { %s1104_s16 = smov 128   ;;  %s1105_s1 = smov 8  }
 0x38b   :  { %886 = dma.vmem_to_hbm [thread:$0]  %s881_s12, 2048, %s1698_s2, [#allocation3], %s1104_s16, %s1104_s16, %s1105_s1  }
 0x38c   :  { %1098 = dma.done.wait [#allocation3], 2048  }
 0x38d   :  { %1099 = vsyncadd [#allocation3], 4294965248 }
 0x38e   :  { %890 = vsyncpa [#allocation3], 1 }

</bundles_post_ra>
